<compile_context>
chip_gen: v7x
topology: tpu7x:2x2x1
jax: 0.10.0
libtpu: 0.0.40
codegen_flags: <defaults>
</compile_context>

<pallas_src>
import functools

import jax
import jax.numpy as jnp
from jax.experimental import pallas as pl
from jax.experimental.pallas import tpu as pltpu


def _round_up(x, m):
    return ((x + m - 1) // m) * m


def _partial_block(base_sum, dist_sum):
    """Pack two scalar partial sums into a lane-dense (1, 8, 128) block."""
    sub = jax.lax.broadcasted_iota(jnp.int32, (1, 8, 128), 1)
    lane = jax.lax.broadcasted_iota(jnp.int32, (1, 8, 128), 2)
    first_row = sub == 0
    return jnp.where(first_row & (lane == 0), base_sum,
                     jnp.where(first_row & (lane == 1), dist_sum, 0.0))


# --------------------------------------------------------------------------
# Kernel for distillation_type == 'none': only student class logits + labels.
# --------------------------------------------------------------------------
def _base_ce_kernel(out_ref, lab_ref, part_ref, *, batch, tile_b):
    i = pl.program_id(0)
    logits = out_ref[...].astype(jnp.float32)      # [TB, C]
    labels = lab_ref[...]                          # [TB, 1] int32
    tb, C = logits.shape

    row = jax.lax.broadcasted_iota(jnp.int32, (tb, 1), 0)
    valid = (i * tile_b + row) < batch             # mask padded rows
    cls = jax.lax.broadcasted_iota(jnp.int32, (tb, C), 1)

    m = jnp.max(logits, axis=-1, keepdims=True)
    lse = m + jnp.log(jnp.sum(jnp.exp(logits - m), axis=-1, keepdims=True))
    picked = jnp.sum(jnp.where(cls == labels, logits, 0.0), axis=-1, keepdims=True)
    base_sum = jnp.sum(jnp.where(valid, lse - picked, 0.0))

    part_ref[...] = _partial_block(base_sum, 0.0)


# --------------------------------------------------------------------------
# Kernel for distillation_type in {'soft', 'hard'}.
# --------------------------------------------------------------------------
def _distill_kernel(x_ref, w_ref, b_ref, out_ref, kd_ref, lab_ref, part_ref,
                    *, batch, tile_b, inv_tau, dist_type):
    i = pl.program_id(0)
    logits = out_ref[...].astype(jnp.float32)      # [TB, C] student class logits
    kd = kd_ref[...].astype(jnp.float32)           # [TB, C] student dist logits
    labels = lab_ref[...]                          # [TB, 1] int32
    tb, C = logits.shape

    row = jax.lax.broadcasted_iota(jnp.int32, (tb, 1), 0)
    valid = (i * tile_b + row) < batch             # mask padded rows
    cls = jax.lax.broadcasted_iota(jnp.int32, (tb, C), 1)

    # ---- base criterion: cross entropy on class logits (per-tile SUM) ----
    m = jnp.max(logits, axis=-1, keepdims=True)
    lse = m + jnp.log(jnp.sum(jnp.exp(logits - m), axis=-1, keepdims=True))
    picked = jnp.sum(jnp.where(cls == labels, logits, 0.0), axis=-1, keepdims=True)
    base_sum = jnp.sum(jnp.where(valid, lse - picked, 0.0))

    # ---- teacher forward (Linear D->C) on the MXU, f32 accumulate ----
    teacher = jnp.dot(x_ref[...], w_ref[...], preferred_element_type=jnp.float32)
    teacher = teacher + b_ref[...].astype(jnp.float32)

    if dist_type == "soft":
        # Fused teacher softmax + log-softmax (single exp pass).
        ts = teacher * inv_tau
        tm = jnp.max(ts, axis=-1, keepdims=True)
        te = jnp.exp(ts - tm)
        tz = jnp.sum(te, axis=-1, keepdims=True)
        t_log = (ts - tm) - jnp.log(tz)
        t_p = te * pl.reciprocal(tz, approx=True)
        # Student dist-token log-softmax at temperature tau.
        ss = kd * inv_tau
        sm = jnp.max(ss, axis=-1, keepdims=True)
        s_lse = sm + jnp.log(jnp.sum(jnp.exp(ss - sm), axis=-1, keepdims=True))
        s_log = ss - s_lse
        # F.kl_div(input=s_log, target=t_log, reduction='sum', log_target=True)
        kl_row = jnp.sum(t_p * (t_log - s_log), axis=-1, keepdims=True)
        dist_sum = jnp.sum(jnp.where(valid, kl_row, 0.0))
    else:  # 'hard'
        tmax = jnp.max(teacher, axis=-1, keepdims=True)
        # first-max index (matches torch.argmax de-facto tie-breaking)
        idx = jnp.min(jnp.where(teacher == tmax, cls, C), axis=-1, keepdims=True)
        km = jnp.max(kd, axis=-1, keepdims=True)
        k_lse = km + jnp.log(jnp.sum(jnp.exp(kd - km), axis=-1, keepdims=True))
        picked_kd = jnp.sum(jnp.where(cls == idx, kd, 0.0), axis=-1, keepdims=True)
        dist_sum = jnp.sum(jnp.where(valid, k_lse - picked_kd, 0.0))

    part_ref[...] = _partial_block(base_sum, dist_sum)


# --------------------------------------------------------------------------
# Wrapper
# --------------------------------------------------------------------------
def distillation_loss(inputs, outputs, labels, teacher_w, teacher_b, *,
                      distillation_type="soft", alpha=0.5, tau=1.0, tile_b=128):
    """JAX/Pallas equivalent of DistillationLoss.forward.

    inputs    [B, D]  (teacher is modeled as Linear(D, C): teacher_w [D,C], teacher_b [C])
    outputs   [B, C] or tuple(outputs [B,C], outputs_kd [B,C])
    labels    [B] int (out-of-range labels contribute 0, like jax.nn.one_hot;
                       torch CrossEntropyLoss would error instead)
    """
    assert distillation_type in ("none", "soft", "hard")

    outputs_kd = None
    if isinstance(outputs, (tuple, list)):
        outputs, outputs_kd = outputs

    B, C = outputs.shape
    labels2d = labels.reshape(B, 1).astype(jnp.int32)

    # Batch tile: multiple of 8, capped by requested tile_b and (padded) B.
    tb = max(8, min(int(tile_b), _round_up(B, 8)))
    tb = _round_up(tb, 8)
    B_pad = _round_up(B, tb)
    num_tiles = B_pad // tb

    def pad_rows(a):
        if a.shape[0] == B_pad:
            return a
        pad = [(0, B_pad - a.shape[0])] + [(0, 0)] * (a.ndim - 1)
        return jnp.pad(a, pad)

    itemsize = 4
    out_block_bytes = 2 * 8 * 128 * 4

    # ------------------------- 'none' path: small kernel -------------------------
    if distillation_type == "none":
        outputs_p = pad_rows(outputs)
        labels_p = pad_rows(labels2d)

        need = 3 * (tb * C + tb) * itemsize + out_block_bytes
        vmem_limit = int(min(32 * 1024 * 1024, max(4 * 1024 * 1024, 2 * need)))

        kernel = functools.partial(_base_ce_kernel, batch=B, tile_b=tb)
        parts = pl.pallas_call(
            kernel,
            grid=(num_tiles,),
            in_specs=[
                pl.BlockSpec((tb, C), lambda i: (i, 0)),   # student class logits
                pl.BlockSpec((tb, 1), lambda i: (i, 0)),   # int32 labels
            ],
            out_specs=pl.BlockSpec((1, 8, 128), lambda i: (i, 0, 0)),
            out_shape=jax.ShapeDtypeStruct((num_tiles, 8, 128), jnp.float32),
            compiler_params=pltpu.CompilerParams(
                dimension_semantics=("parallel",),
                vmem_limit_bytes=vmem_limit),
        )(outputs_p, labels_p)
        return jnp.sum(parts[:, 0, 0]) / B   # global-B mean

    # ------------------------- 'soft' / 'hard' path -------------------------
    if outputs_kd is None:
        raise ValueError("When knowledge distillation is enabled, the model is "
                         "expected to return a Tuple[Tensor, Tensor].")

    D = inputs.shape[1]
    inputs_p = pad_rows(inputs)
    outputs_p = pad_rows(outputs)
    kd_p = pad_rows(outputs_kd)
    labels_p = pad_rows(labels2d)
    b2d = teacher_b.reshape(1, C)

    # Double-buffered batch tiles + resident teacher weight/bias.
    need = (3 * (tb * D + 2 * tb * C + tb) + (D * C + C)) * itemsize + out_block_bytes
    vmem_limit = int(min(32 * 1024 * 1024, max(4 * 1024 * 1024, 2 * need)))

    kernel = functools.partial(
        _distill_kernel, batch=B, tile_b=tb,
        inv_tau=float(1.0 / tau), dist_type=distillation_type)

    parts = pl.pallas_call(
        kernel,
        grid=(num_tiles,),
        in_specs=[
            pl.BlockSpec((tb, D), lambda i: (i, 0)),   # inputs tile
            pl.BlockSpec((D, C), lambda i: (0, 0)),    # teacher weight (resident)
            pl.BlockSpec((1, C), lambda i: (0, 0)),    # teacher bias  (resident)
            pl.BlockSpec((tb, C), lambda i: (i, 0)),   # student class logits tile
            pl.BlockSpec((tb, C), lambda i: (i, 0)),   # student dist logits tile
            pl.BlockSpec((tb, 1), lambda i: (i, 0)),   # int32 labels tile
        ],
        out_specs=pl.BlockSpec((1, 8, 128), lambda i: (i, 0, 0)),
        out_shape=jax.ShapeDtypeStruct((num_tiles, 8, 128), jnp.float32),
        compiler_params=pltpu.CompilerParams(
            dimension_semantics=("parallel",),
            vmem_limit_bytes=vmem_limit),
    )(inputs_p, teacher_w, b2d, outputs_p, kd_p, labels_p)

    base_loss = jnp.sum(parts[:, 0, 0]) / B          # global-B mean
    dist_sum = jnp.sum(parts[:, 0, 1])
    if distillation_type == "soft":
        distill = dist_sum * (tau * tau) / (B * C)   # / kd.numel() with global B
    else:
        distill = dist_sum / B
    return base_loss * (1.0 - alpha) + distill * alpha


# --------------------------------------------------------------------------
# Pure-JAX reference (for a loose sanity check only).
# --------------------------------------------------------------------------
def _ref_loss(inputs, outputs, outputs_kd, labels, w, b, dist_type, alpha, tau):
    logp = jax.nn.log_softmax(outputs, axis=-1)
    base = -jnp.mean(jnp.take_along_axis(logp, labels[:, None], axis=-1))
    if dist_type == "none":
        return base
    teacher = inputs @ w + b
    if dist_type == "soft":
        T = tau
        s_log = jax.nn.log_softmax(outputs_kd / T, axis=-1)
        t_log = jax.nn.log_softmax(teacher / T, axis=-1)
        kl = jnp.sum(jnp.exp(t_log) * (t_log - s_log))
        dist = kl * (T * T) / outputs_kd.size
    else:
        tgt = jnp.argmax(teacher, axis=-1)
        logkd = jax.nn.log_softmax(outputs_kd, axis=-1)
        dist = -jnp.mean(jnp.take_along_axis(logkd, tgt[:, None], axis=-1))
    return base * (1.0 - alpha) + dist * alpha


if __name__ == "__main__":
    key = jax.random.PRNGKey(0)
    k1, k2, k3, k4, k5, k6 = jax.random.split(key, 6)

    B, D, C = 16, 32, 128   # batch, input features, num classes

    inputs = jax.random.normal(k1, (B, D), jnp.float32)
    outputs = jax.random.normal(k2, (B, C), jnp.float32)       # class-token logits
    outputs_kd = jax.random.normal(k3, (B, C), jnp.float32)    # dist-token logits
    labels = jax.random.randint(k4, (B,), 0, C, dtype=jnp.int32)

    # Deterministic synthetic teacher (Linear D -> C).
    # TODO(synk): arbitrary teacher_model / base_criterion modules are modeled as
    # Linear(D->C) + mean CrossEntropyLoss (the common DeiT configuration).
    teacher_w = jax.random.normal(k5, (D, C), jnp.float32) * 0.05
    teacher_b = jax.random.normal(k6, (C,), jnp.float32) * 0.01

    loss_soft = distillation_loss(
        inputs, (outputs, outputs_kd), labels, teacher_w, teacher_b,
        distillation_type="soft", alpha=0.5, tau=3.0, tile_b=8)
    loss_hard = distillation_loss(
        inputs, (outputs, outputs_kd), labels, teacher_w, teacher_b,
        distillation_type="hard", alpha=0.5, tau=3.0, tile_b=8)
    loss_none = distillation_loss(
        inputs, outputs, labels, teacher_w, teacher_b,
        distillation_type="none", alpha=0.5, tau=3.0, tile_b=8)

    jax.block_until_ready((loss_soft, loss_hard, loss_none))

    # Loose sanity check against the pure-JAX reference (approx reciprocal in-kernel).
    ref_soft = _ref_loss(inputs, outputs, outputs_kd, labels, teacher_w, teacher_b,
                         "soft", 0.5, 3.0)
    ref_hard = _ref_loss(inputs, outputs, outputs_kd, labels, teacher_w, teacher_b,
                         "hard", 0.5, 3.0)
    ref_none = _ref_loss(inputs, outputs, outputs_kd, labels, teacher_w, teacher_b,
                         "none", 0.5, 3.0)
    assert jnp.allclose(loss_soft, ref_soft, rtol=5e-2, atol=5e-2)
    assert jnp.allclose(loss_hard, ref_hard, rtol=5e-2, atol=5e-2)
    assert jnp.allclose(loss_none, ref_none, rtol=5e-2, atol=5e-2)

    print("KERNEL_OK")
</pallas_src>

<mosaic_0001>
module attributes {stable_mosaic.version = 11 : i64} {
  func.func @_distill_kernel(%arg0: i32, %arg1: memref<8x32xf32, #tpu.memory_space<vmem>>, %arg2: memref<32x128xf32, #tpu.memory_space<vmem>>, %arg3: memref<1x128xf32, #tpu.memory_space<vmem>>, %arg4: memref<8x128xf32, #tpu.memory_space<vmem>>, %arg5: memref<8x128xf32, #tpu.memory_space<vmem>>, %arg6: memref<8x1xi32, #tpu.memory_space<vmem>>, %arg7: memref<1x8x128xf32, #tpu.memory_space<vmem>>) attributes {dimension_semantics = [#tpu.dimension_semantics<parallel>], iteration_bounds = array<i64: 2>, scalar_prefetch = 0 : i64, scratch_operands = 0 : i64, tpu.core_type = #tpu.core_type<tc>, window_params = [{transform_indices = @transform_0, window_bounds = array<i64: 8, 32>}, {pipeline_mode = #tpu.pipeline_mode<synchronous>, transform_indices = @transform_1, window_bounds = array<i64: 32, 128>}, {pipeline_mode = #tpu.pipeline_mode<synchronous>, transform_indices = @transform_2, window_bounds = array<i64: 1, 128>}, {transform_indices = @transform_3, window_bounds = array<i64: 8, 128>}, {transform_indices = @transform_4, window_bounds = array<i64: 8, 128>}, {transform_indices = @transform_5, window_bounds = array<i64: 8, 1>}, {transform_indices = @transform_6, window_bounds = array<i64: 1, 8, 128>}]} {
    %c0 = arith.constant 0 : index
    %c0_0 = arith.constant 0 : index
    %0 = vector.load %arg4[%c0, %c0_0] : memref<8x128xf32, #tpu.memory_space<vmem>>, vector<8x128xf32>
    %c0_1 = arith.constant 0 : index
    %c0_2 = arith.constant 0 : index
    %1 = vector.load %arg5[%c0_1, %c0_2] : memref<8x128xf32, #tpu.memory_space<vmem>>, vector<8x128xf32>
    %c0_3 = arith.constant 0 : index
    %c0_4 = arith.constant 0 : index
    %2 = vector.load %arg6[%c0_3, %c0_4] : memref<8x1xi32, #tpu.memory_space<vmem>>, vector<8x1xi32>
    %3 = tpu.iota {dimensions = array<i32: 0>} : vector<8x1xi32>
    %c8_i32 = arith.constant 8 : i32
    %4 = arith.muli %arg0, %c8_i32 : i32
    %5 = vector.broadcast %4 : i32 to vector<8x1xi32>
    %6 = arith.addi %5, %3 : vector<8x1xi32>
    %c16_i32 = arith.constant 16 : i32
    %7 = vector.broadcast %c16_i32 : i32 to vector<8x1xi32>
    %8 = arith.cmpi slt, %6, %7 : vector<8x1xi32>
    %9 = tpu.iota {dimensions = array<i32: 1>} : vector<8x128xi32>
    %cst = arith.constant dense<0xFF800000> : vector<8xf32>
    %10 = vector.multi_reduction <maximumf>, %0, %cst [1] : vector<8x128xf32> to vector<8xf32>
    %11 = vector.shape_cast %10 : vector<8xf32> to vector<8x1xf32>
    %12 = vector.broadcast %11 : vector<8x1xf32> to vector<8x128xf32>
    %13 = arith.subf %0, %12 : vector<8x128xf32>
    %14 = math.exp %13 : vector<8x128xf32>
    %cst_5 = arith.constant dense<0.000000e+00> : vector<8xf32>
    %15 = vector.multi_reduction <add>, %14, %cst_5 [1] : vector<8x128xf32> to vector<8xf32>
    %16 = vector.shape_cast %15 : vector<8xf32> to vector<8x1xf32>
    %17 = math.log %16 : vector<8x1xf32>
    %18 = arith.addf %11, %17 : vector<8x1xf32>
    %19 = vector.broadcast %2 : vector<8x1xi32> to vector<8x128xi32>
    %20 = arith.cmpi eq, %9, %19 : vector<8x128xi32>
    %cst_6 = arith.constant 0.000000e+00 : f32
    %21 = vector.broadcast %cst_6 : f32 to vector<8x128xf32>
    %22 = arith.select %20, %0, %21 : vector<8x128xi1>, vector<8x128xf32>
    %cst_7 = arith.constant dense<0.000000e+00> : vector<8xf32>
    %23 = vector.multi_reduction <add>, %22, %cst_7 [1] : vector<8x128xf32> to vector<8xf32>
    %24 = vector.shape_cast %23 : vector<8xf32> to vector<8x1xf32>
    %25 = arith.subf %18, %24 : vector<8x1xf32>
    %cst_8 = arith.constant 0.000000e+00 : f32
    %26 = vector.broadcast %cst_8 : f32 to vector<8x1xf32>
    %27 = arith.select %8, %25, %26 : vector<8x1xi1>, vector<8x1xf32>
    %28 = vector.shape_cast %27 : vector<8x1xf32> to vector<1x8x1xf32>
    %cst_9 = arith.constant dense<0.000000e+00> : vector<1xf32>
    %29 = vector.multi_reduction <add>, %28, %cst_9 [1, 2] : vector<1x8x1xf32> to vector<1xf32>
    %30 = vector.shape_cast %29 : vector<1xf32> to vector<1x1x1xf32>
    %31 = vector.extract %30[0, 0, 0] : f32 from vector<1x1x1xf32>
    %c0_10 = arith.constant 0 : index
    %c0_11 = arith.constant 0 : index
    %32 = vector.load %arg1[%c0_10, %c0_11] : memref<8x32xf32, #tpu.memory_space<vmem>>, vector<8x32xf32>
    %c0_12 = arith.constant 0 : index
    %c0_13 = arith.constant 0 : index
    %33 = vector.load %arg2[%c0_12, %c0_13] : memref<32x128xf32, #tpu.memory_space<vmem>>, vector<32x128xf32>
    %cst_14 = arith.constant dense<0.000000e+00> : vector<8x128xf32>
    %34 = tpu.matmul %32, %33, %cst_14 {dimension_numbers = #tpu.dot_dimension_numbers<[1], [0], [0], [1], [0, 0, 1, 1], [], []>} : vector<8x32xf32>, vector<32x128xf32>, vector<8x128xf32> -> vector<8x128xf32>
    %c0_15 = arith.constant 0 : index
    %c0_16 = arith.constant 0 : index
    %35 = vector.load %arg3[%c0_15, %c0_16] : memref<1x128xf32, #tpu.memory_space<vmem>>, vector<1x128xf32>
    %36 = vector.broadcast %35 : vector<1x128xf32> to vector<8x128xf32>
    %37 = arith.addf %34, %36 : vector<8x128xf32>
    %cst_17 = arith.constant 0.333333343 : f32
    %38 = vector.broadcast %cst_17 : f32 to vector<8x128xf32>
    %39 = arith.mulf %37, %38 : vector<8x128xf32>
    %cst_18 = arith.constant dense<0xFF800000> : vector<8xf32>
    %40 = vector.multi_reduction <maximumf>, %39, %cst_18 [1] : vector<8x128xf32> to vector<8xf32>
    %41 = vector.shape_cast %40 : vector<8xf32> to vector<8x1xf32>
    %42 = vector.broadcast %41 : vector<8x1xf32> to vector<8x128xf32>
    %43 = arith.subf %39, %42 : vector<8x128xf32>
    %44 = math.exp %43 : vector<8x128xf32>
    %cst_19 = arith.constant dense<0.000000e+00> : vector<8xf32>
    %45 = vector.multi_reduction <add>, %44, %cst_19 [1] : vector<8x128xf32> to vector<8xf32>
    %46 = vector.shape_cast %45 : vector<8xf32> to vector<8x1xf32>
    %47 = vector.broadcast %41 : vector<8x1xf32> to vector<8x128xf32>
    %48 = arith.subf %39, %47 : vector<8x128xf32>
    %49 = math.log %46 : vector<8x1xf32>
    %50 = vector.broadcast %49 : vector<8x1xf32> to vector<8x128xf32>
    %51 = arith.subf %48, %50 : vector<8x128xf32>
    %52 = tpu.reciprocal %46 {approx = true} : vector<8x1xf32> -> vector<8x1xf32>
    %53 = vector.broadcast %52 : vector<8x1xf32> to vector<8x128xf32>
    %54 = arith.mulf %44, %53 : vector<8x128xf32>
    %cst_20 = arith.constant 0.333333343 : f32
    %55 = vector.broadcast %cst_20 : f32 to vector<8x128xf32>
    %56 = arith.mulf %1, %55 : vector<8x128xf32>
    %cst_21 = arith.constant dense<0xFF800000> : vector<8xf32>
    %57 = vector.multi_reduction <maximumf>, %56, %cst_21 [1] : vector<8x128xf32> to vector<8xf32>
    %58 = vector.shape_cast %57 : vector<8xf32> to vector<8x1xf32>
    %59 = vector.broadcast %58 : vector<8x1xf32> to vector<8x128xf32>
    %60 = arith.subf %56, %59 : vector<8x128xf32>
    %61 = math.exp %60 : vector<8x128xf32>
    %cst_22 = arith.constant dense<0.000000e+00> : vector<8xf32>
    %62 = vector.multi_reduction <add>, %61, %cst_22 [1] : vector<8x128xf32> to vector<8xf32>
    %63 = vector.shape_cast %62 : vector<8xf32> to vector<8x1xf32>
    %64 = math.log %63 : vector<8x1xf32>
    %65 = arith.addf %58, %64 : vector<8x1xf32>
    %66 = vector.broadcast %65 : vector<8x1xf32> to vector<8x128xf32>
    %67 = arith.subf %56, %66 : vector<8x128xf32>
    %68 = arith.subf %51, %67 : vector<8x128xf32>
    %69 = arith.mulf %54, %68 : vector<8x128xf32>
    %cst_23 = arith.constant dense<0.000000e+00> : vector<8xf32>
    %70 = vector.multi_reduction <add>, %69, %cst_23 [1] : vector<8x128xf32> to vector<8xf32>
    %71 = vector.shape_cast %70 : vector<8xf32> to vector<8x1xf32>
    %cst_24 = arith.constant 0.000000e+00 : f32
    %72 = vector.broadcast %cst_24 : f32 to vector<8x1xf32>
    %73 = arith.select %8, %71, %72 : vector<8x1xi1>, vector<8x1xf32>
    %74 = vector.shape_cast %73 : vector<8x1xf32> to vector<1x8x1xf32>
    %cst_25 = arith.constant dense<0.000000e+00> : vector<1xf32>
    %75 = vector.multi_reduction <add>, %74, %cst_25 [1, 2] : vector<1x8x1xf32> to vector<1xf32>
    %76 = vector.shape_cast %75 : vector<1xf32> to vector<1x1x1xf32>
    %77 = vector.extract %76[0, 0, 0] : f32 from vector<1x1x1xf32>
    %78 = tpu.iota {dimensions = array<i32: 1>} : vector<1x8x128xi32>
    %79 = tpu.iota {dimensions = array<i32: 2>} : vector<1x8x128xi32>
    %c0_i32 = arith.constant 0 : i32
    %80 = vector.broadcast %c0_i32 : i32 to vector<1x8x128xi32>
    %81 = arith.cmpi eq, %78, %80 : vector<1x8x128xi32>
    %c0_i32_26 = arith.constant 0 : i32
    %82 = vector.broadcast %c0_i32_26 : i32 to vector<1x8x128xi32>
    %83 = arith.cmpi eq, %79, %82 : vector<1x8x128xi32>
    %84 = arith.andi %81, %83 : vector<1x8x128xi1>
    %c1_i32 = arith.constant 1 : i32
    %85 = vector.broadcast %c1_i32 : i32 to vector<1x8x128xi32>
    %86 = arith.cmpi eq, %79, %85 : vector<1x8x128xi32>
    %87 = arith.andi %81, %86 : vector<1x8x128xi1>
    %cst_27 = arith.constant 0.000000e+00 : f32
    %88 = vector.broadcast %77 : f32 to vector<1x8x128xf32>
    %89 = vector.broadcast %cst_27 : f32 to vector<1x8x128xf32>
    %90 = arith.select %87, %88, %89 : vector<1x8x128xi1>, vector<1x8x128xf32>
    %91 = vector.broadcast %31 : f32 to vector<1x8x128xf32>
    %92 = arith.select %84, %91, %90 : vector<1x8x128xi1>, vector<1x8x128xf32>
    %c0_28 = arith.constant 0 : index
    %c0_29 = arith.constant 0 : index
    %c0_30 = arith.constant 0 : index
    %93 = vector.load %arg7[%c0_28, %c0_29, %c0_30] : memref<1x8x128xf32, #tpu.memory_space<vmem>>, vector<1x8x128xf32>
    tpu.vector_store %arg7[%c0_28, %c0_29, %c0_30], %92 {strides = array<i32>} : memref<1x8x128xf32, #tpu.memory_space<vmem>>, vector<1x8x128xf32>,
    return
  }
  func.func @transform_0(%arg0: i32) -> (i32, i32) {
    %c0_i32 = arith.constant 0 : i32
    %c0_i32_0 = arith.constant 0 : i32
    return %arg0, %c0_i32 : i32, i32
  }
  func.func @transform_1(%arg0: i32) -> (i32, i32) {
    %c0_i32 = arith.constant 0 : i32
    %c0_i32_0 = arith.constant 0 : i32
    %c0_i32_1 = arith.constant 0 : i32
    return %c0_i32, %c0_i32_0 : i32, i32
  }
  func.func @transform_2(%arg0: i32) -> (i32, i32) {
    %c0_i32 = arith.constant 0 : i32
    %c0_i32_0 = arith.constant 0 : i32
    %c0_i32_1 = arith.constant 0 : i32
    return %c0_i32, %c0_i32_0 : i32, i32
  }
  func.func @transform_3(%arg0: i32) -> (i32, i32) {
    %c0_i32 = arith.constant 0 : i32
    %c0_i32_0 = arith.constant 0 : i32
    return %arg0, %c0_i32 : i32, i32
  }
  func.func @transform_4(%arg0: i32) -> (i32, i32) {
    %c0_i32 = arith.constant 0 : i32
    %c0_i32_0 = arith.constant 0 : i32
    return %arg0, %c0_i32 : i32, i32
  }
  func.func @transform_5(%arg0: i32) -> (i32, i32) {
    %c0_i32 = arith.constant 0 : i32
    %c0_i32_0 = arith.constant 0 : i32
    return %arg0, %c0_i32 : i32, i32
  }
  func.func @transform_6(%arg0: i32) -> (i32, i32, i32) {
    %c0_i32 = arith.constant 0 : i32
    %c0_i32_0 = arith.constant 0 : i32
    %c0_i32_1 = arith.constant 0 : i32
    return %arg0, %c0_i32, %c0_i32_0 : i32, i32, i32
  }
}

</mosaic_0001>

<bundles_post_ra>
// kernel: tpu_custom_call.1
= control target key start
LH: loop header
LB: loop body
LE: loop exit
PB: predicated region body
PF: predicated region fallthrough
CT: control target
= control target key end

     0   :  { %11 = vsyncpa [#allocation3], 0  ;;  %s1269_s0 = inlined_call_operand.vmem [shape: f32[16,32], index: 0, kind: input, shape index: {}]   ;;  %s1270_s1 = inlined_call_operand.hbm [shape: f32[32,128], index: 1, kind: input, shape index: {}]   ;;  %s1271_s2 = inlined_call_operand.hbm [shape: f32[1,128], index: 2, kind: input, shape index: {}]   ;;  %s1272_s3 = inlined_call_operand.hbm [shape: f32[16,128], index: 3, kind: input, shape index: {}]   ;;  %s1273_s4 = inlined_call_operand.vmem [shape: f32[16,128], index: 4, kind: input, shape index: {}]   ;;  %s1274_s5 = inlined_call_operand.vmem [shape: s32[16,1], index: 5, kind: input, shape index: {}]   ;;  %s1275_s6 = inlined_call_operand.hbm [shape: f32[2,8,128], index: 6, kind: output, shape index: {}]  }
   0x1   :  { %12 = vsyncpa [#allocation6], 0 }
   0x2   :  { %13 = vsyncpa [#allocation4], 0 }
   0x3   :  { %15 = vsyncpa [#allocation4 + $0x1], 0  ;;  %s1003_s21 = smov 0   ;;  %s1005_s22 = smov 0  }
   0x4   :  { %s1007_s23 = smov 0   ;;  %s1009_s24 = smov 0  }
   0x5 LB: > { %s1024_s25 = sadd.s32 4294967295, %s956_s24   ;;  %s659_s26 = sadd.s32 4294967294, %s956_s24   ;;  %s956_s24 = sphi %s1009_s24, %s1297_s24   ;;  %s952_s23 = sphi %s1007_s23, %s1296_s23   ;;  %s948_s22 = sphi %s1005_s22, %s1295_s22   ;;  %s944_s21 = sphi %s1003_s21, %s1294_s21  }
   0x6   : > { %p109_p0 = scmp.ne.s32.totalorder %s948_s22, %s944_s21  ;;  %p1276_p1 = scmp.eq.s32.totalorder %s1024_s25, 0 }
   0x7   : > { %p191_p3 = scmp.eq.s32.totalorder %s659_s26, 1  ;;  %p660_p5 = scmp.ge.s32.totalorder %s956_s24, 1 }
   0x8   : > { %p1033_p4 = por %p1276_p1, %p109_p0  ;;  %p198_p7 = scmp.lt.s32.totalorder %s956_s24, 3 }
   0x9   : > { %p1038_p6 = por %p191_p3, %p109_p0  ;;  %s958_s30 = smov [#allocation2]  }
   0xa   : > { %s1279_s27 = scalar_select %p1033_p4, 1, 0 }
   0xb   : > { %s1280_s28 = scalar_select %p1038_p6, 1, 0 }
   0xc   : > { %p1043_p8 = pnand %p660_p5, %p198_p7  ;;  %s210_s7 = sshll.u32 %s958_s30, 4  ;;  %s1047_s7 = int_to_ptr.vmem [resolvable:$true] %s210_s7 }
   0xd   : > { %s959_s9 = smov [#allocation5]   ;;  %s796_s13 = scalar_lea.hbm %s1270_s1, 512 }
   0xe   : > { %p719_p9 = pneg %p1043_p8  ;;  %s224_s10 = sshll.u32 %s959_s9, 4  ;;  %s1058_s10 = int_to_ptr.vmem [resolvable:$true] %s224_s10 }
   0xf   : > { %p797_p12 = scmp.ne.s32.totalorder %s1270_s1, %s796_s13  ;;  %p803_p5 = scmp.lt.u32.totalorder %s796_s13, %s1270_s1 }
  0x10   : > { %p1054_p11 = pnand %p719_p9, %p1276_p1 }
  0x12   : > { %p798_p13 = pneg %p1054_p11 }
  0x14   : > { %p799_p0 = pnand %p798_p13, %p797_p12 }
  0x16   : > { %p800_p3 = pneg %p799_p0 }
  0x18   : > { %p805_p7 = pnand %p803_p5, %p800_p3 }
  0x1a   : > { %808 = shalt.err (!%p805_p7)
}
  0x1b   : > { %s809_s18 = scalar_lea.vmem %s1047_s7, 512  ;;  %p817_p2 = scmp.lt.s32.totalorder %s1047_s7, %s1047_s7 }
  0x1c   : > { %p810_p9 = scmp.ne.s32.totalorder %s1047_s7, %s809_s18  ;;  %p818_p12 = scmp.lt.s32.totalorder %s809_s18, %s809_s18 }
  0x1e   : > { %p812_p10 = pnand %p810_p9, %p798_p13  ;;  %p819_p0 = por %p818_p12, %p817_p2 }
  0x20   : > { %p813_p1 = pneg %p812_p10 }
  0x22   : > { %p820_p6 = pnand %p819_p0, %p813_p1 }
  0x24   : > { %823 = shalt.err (!%p820_p6)
}
  0x25   : > { %s960_s19 = smov 128   ;;  %s961_s20 = smov 8  }
  0x26   : > { %722 = dma.hbm_to_vmem [thread:$0]  (!%p1054_p11), %s1270_s1, 512, %s1047_s7, [#allocation3], %s960_s19, %s960_s19, %s961_s20  }
  0x27   : > { %s824_s12 = scalar_lea.hbm %s1271_s2, 16 }
  0x28   : > { %p825_p2 = scmp.ne.s32.totalorder %s1271_s2, %s824_s12  ;;  %p831_p10 = scmp.lt.u32.totalorder %s824_s12, %s1271_s2 }
  0x2a   : > { %p827_p1 = pnand %p825_p2, %p798_p13 }
  0x2c   : > { %p828_p6 = pneg %p827_p1 }
  0x2e   : > { %p833_p3 = pnand %p831_p10, %p828_p6 }
  0x30   : > { %836 = shalt.err (!%p833_p3)
}
  0x31   : > { %s837_s7 = scalar_lea.vmem %s1058_s10, 16  ;;  %s844_s17 = scalar_lea.vmem %s1058_s10, 32 }
  0x32   : > { %p838_p5 = scmp.ne.s32.totalorder %s1058_s10, %s837_s7  ;;  %p845_p12 = scmp.lt.s32.totalorder %s1058_s10, %s1058_s10 }
  0x33   : > { %p846_p0 = scmp.lt.s32.totalorder %s844_s17, %s837_s7 }
  0x34   : > { %p840_p7 = pnand %p838_p5, %p798_p13 }
  0x35   : > { %p847_p2 = por %p846_p0, %p845_p12 }
  0x36   : > { %p841_p9 = pneg %p840_p7 }
  0x38   : > { %p848_p1 = pnand %p847_p2, %p841_p9 }
  0x3a   : > { %851 = shalt.err (!%p848_p1)
}
  0x3b   : > { %725 = dma.hbm_to_vmem [thread:$0]  (!%p1054_p11), %s1271_s2, 16, %s1058_s10, [#allocation6]  }
  0x3c   : > { %s1114_s20 = sadd.s32 1, %s956_s24   ;;  %s96_s8 = sadd.s32 1, %s952_s23 }
  0x3d   : > { %s93_s26 = ssub.s32 %s956_s24, %s1114_s20  ;;  %p103_p13 = scmp.ne.s32.totalorder %s952_s23, %s948_s22 }
  0x3e   : > { %p94_p6 = scmp.eq.s32.totalorder %s93_s26, 0  ;;  %p104_p10 = scmp.eq.s32.totalorder %s956_s24, 0 }
  0x3f   : > { %p1283_p3 = scmp.eq.s32.totalorder %s1024_s25, 1  ;;  %p736_p7 = scmp.lt.s32.totalorder %s956_s24, 2 }
  0x40   : > { %s1130_s9 = scalar_select %p94_p6, %s952_s23, %s96_s8  }
  0x41   : > { %p1124_p5 = por %p1283_p3, %p103_p13  ;;  %p105_p9 = por %p104_p10, %p103_p13 }
  0x42   : > { %s242_s11 = sand.u32 1, %s956_s24   ;;  %s244_s12 = sand.u32 1, %s952_s23  }
  0x43   : > { %s1284_s30 = scalar_select %p1124_p5, 1, 0 }
  0x44   : > { %s664_s10 = sshll.u32 %s244_s12, 3  ;;  %s665_s13 = sshll.u32 %s956_s24, 7 }
  0x45   : > { %s1138_s16 = scalar_lea.hbm %s1272_s3, %s665_s13  ;;  %s246_s7 = scalar_lea.vmem [#allocation7], %s664_s10 }
  0x46   : > { %s253_s17 = sshll.u32 %s246_s7, 4  ;;  %p1140_p11 = pnand %p736_p7, %p105_p9  ;;  %s1144_s17 = int_to_ptr.vmem [resolvable:$true] %s253_s17 }
  0x47   : > { %s243_s19 = scalar_lea.sflag [#allocation3], %s242_s11  ;;  %s852_s8 = scalar_lea.hbm %s1138_s16, 128 }
  0x48   : > { %p853_p12 = scmp.ne.s32.totalorder %s1138_s16, %s852_s8  ;;  %p854_p0 = pneg %p1140_p11 }
  0x49   : > { %s857_s10 = scalar_lea.hbm %s1272_s3, 256  ;;  %p858_p13 = scmp.lt.u32.totalorder %s1138_s16, %s1272_s3 }
  0x4a   : > { %p855_p2 = pnand %p854_p0, %p853_p12  ;;  %p859_p6 = scmp.lt.u32.totalorder %s857_s10, %s852_s8 }
  0x4b   : > { %p861_p3 = scmp.lt.u32.totalorder %s852_s8, %s1138_s16 }
  0x4c   : > { %p856_p1 = pneg %p855_p2  ;;  %p860_p10 = por %p859_p6, %p858_p13 }
  0x4e   : > { %p862_p7 = por %p861_p3, %p860_p10 }
  0x50   : > { %p863_p9 = pnand %p862_p7, %p856_p1 }
  0x52   : > { %866 = shalt.err (!%p863_p9)
}
  0x53   : > { %s867_s11 = scalar_lea.vmem %s1144_s17, 128  ;;  %s962_s15 = smov [#allocation7]  }
  0x54   : > { %p868_p12 = scmp.ne.s32.totalorder %s1144_s17, %s867_s11  ;;  %s872_s7 = sshll.u32 %s962_s15, 4  ;;  %s873_s7 = int_to_ptr.vmem [resolvable:$false] %s872_s7 }
  0x55   : > { %s874_s26 = scalar_lea.vmem %s873_s7, 256  ;;  %p875_p4 = scmp.lt.s32.totalorder %s1144_s17, %s873_s7 }
  0x56   : > { %p870_p2 = pnand %p868_p12, %p854_p0  ;;  %p876_p13 = scmp.lt.s32.totalorder %s874_s26, %s867_s11 }
  0x58   : > { %p871_p5 = pneg %p870_p2  ;;  %p877_p6 = por %p876_p13, %p875_p4 }
  0x5a   : > { %p878_p10 = pnand %p877_p6, %p871_p5 }
  0x5c   : > { %881 = shalt.err (!%p878_p10)
}
  0x5d   : > { %729 = dma.hbm_to_vmem [thread:$0]  (!%p1140_p11), %s1138_s16, 128, %s1144_s17, %s243_s19  }
  0x5e   : > { %276 = sbr.rel (%p1043_p8) target bundleno = 1020 (0x3fc), region = 44  ;;  %p1286_p0 = scmp.eq.s32.totalorder (!%p1043_p8), %s1024_s25, 0 }
  0x65   : > { %927 = dma.done.wait (%p1286_p0), [#allocation3], 512   ;;  %p1287_p1 = pmov %p1286_p0 }
  0x66   : > { %p1288_p3 = pmov %p1286_p0 }
  0x67   : > { %929 = vsyncadd (%p1287_p1), [#allocation3], 4294966784 }
  0x68   : > { %931 = dma.done.wait (%p1288_p3), [#allocation6], 16   ;;  %p1289_p4 = pmov %p1286_p0 }
  0x69   : > { %s286_s16 = sand.u32 1, %s1024_s25   ;;  %s288_s17 = sand.u32 1, %s948_s22  }
  0x6a   : > { %933 = vsyncadd (%p1289_p4), [#allocation6], 4294967280  ;;  %s1185_s29 = sshll.u32 %s288_s17, 3  ;;  %s287_s18 = scalar_lea.sflag [#allocation3], %s286_s16 }
  0x6b   : > { %s290_s19 = scalar_lea.vmem [#allocation7], %s1185_s29  ;;  %p1290_p8 = scmp.ne.s32.totalorder %s1279_s27, 0 }
  0x6d   : > { %935 = dma.done.wait (%p1290_p8), %s287_s18, 128  }
  0x6e   : > { %937 = vsyncadd (%p1290_p8), %s287_s18, 4294967168  ;;  %p331_p5 = scmp.lt.s32.totalorder %s1024_s25, 1  ;;  %v963_v0 = vmov 0.0|0.0   ;;  %vm964_vm0 = vmmov 0   ;;  %v965_v1 = vmov 0.0   ;;  %v385_v2 = vld [vmem:[#allocation2] sm:$0xff]  ;;  %v346_v29 = vlaneseq }
  0x6f   : > { %697 = vmatprep.subr.bf16.mxu0 %v963_v0  ;;  %694 = vmatprep.mubr.msk.f32.mxu0 %vm964_vm0, %v965_v1  ;;  %v386_v3 = vld [vmem:[#allocation2 + $0x8] sm:$0xff]  ;;  %v387_v4 = vld [vmem:[#allocation2 + $0x10] sm:$0xff]  ;;  %v388_v6 = vld [vmem:[#allocation2 + $0x18] sm:$0xff]  ;;  %vm396_vm1 = vcmask 261120   ;;  %v966_v12 = vmov 0   ;;  %s674_s18 = sshll.u32 %s1024_s25, 3 }
  0x70   : > { %s332_s8 = scalar_select %p331_p5, %s1024_s25, 1  ;;  %v698_v5 = vpack.c.bf16 %v386_v3, %v385_v2  ;;  %v701_v9 = vpack.c.bf16 %v388_v6, %v387_v4  ;;  %v343_v11 = vld [vmem:[%s290_s19] sm:$0xff]  ;;  %780 = vset.pattern.permute.xlu1 %v966_v12  ;;  %781 = vset.pattern.permute.xlu0 %v966_v12  ;;  %v675_v18 = vld [vmem:[#allocation5] ss:$0 sm:$0xff]  ;;  %v1212_v31 = vand.u32 127, %v346_v29  ;;  %v347_v42 = vshrl.u32 %v346_v29, 7 }
  0x71   : > { %354 = vmax.xlane.f32.xlu1 %v343_v11  ;;  %v349_v44 = vstv %s674_s18  ;;  %vm373_vm4 = vcmask 7168   ;;  %p1291_p7 = scmp.ne.s32.totalorder %s1284_s30, 0 }
  0x72   : > { %s1194_s12 = sshll.u32 %s332_s8, 3  ;;  %699 = vmatpush3.bf16.msra.mxu0 %v698_v5  ;;  %v350_v49 = vadd.s32 %v349_v44, %v347_v42  ;;  %vm510_vm5 = vcmp.eq.s32.totalorder %v347_v42, 0  ;;  %vm513_vm6 = vcmp.eq.s32.totalorder %v1212_v31, 1  ;;  %vm511_vm7 = vcmp.eq.s32.totalorder %v1212_v31, 0  ;;  %s678_s8 = sshll.u32 %s1024_s25, 7 }
  0x73   : > { %s338_s14 = scalar_lea.vmem %s1273_s4, %s1194_s12  ;;  %700 = vmatprep.subr.bf16.mxu0 %v963_v0  ;;  %s334_s15 = scalar_lea.vmem %s1269_s0, %s1194_s12  ;;  %vm514_vm8 = vmand %vm510_vm5, %vm513_vm6 }
  0x74   : > { %v344_v7 = vld [vmem:[%s338_s14] sm:$0xff]  ;;  %s342_s16 = scalar_lea.vmem %s1274_s5, %s1194_s12  ;;  %vm351_vm3 = vcmp.lt.s32.totalorder %v350_v49, 16  ;;  %s330_s12 = scalar_lea.vmem [#allocation8], %s1185_s29  ;;  %vm512_vm9 = vmand %vm510_vm5, %vm511_vm7 }
  0x75   : > { %v1200_v8 = vmul.f32 0.33333334, %v344_v7  ;;  %v384_v10 = vld [vmem:[%s334_s15] sm:$0xff]  ;;  %s534_s10 = sshll.u32 %s330_s12, 4  ;;  %s1224_s11 = scalar_lea.hbm %s1275_s6, %s678_s8  ;;  %s1226_s10 = int_to_ptr.vmem [resolvable:$true] %s534_s10 }
  0x76   : > { %702 = vmatpush3.bf16.msra.mxu0 %v701_v9  ;;  %v345_v17 = vld [vmem:[%s342_s16] sm:$0xff]  ;;  %s521_s25 = scalar_lea.sflag [#allocation4], %s288_s17  ;;  %s882_s29 = scalar_lea.vmem %s1226_s10, 128 }
  0x77   : > { %484 = vmax.xlane.f32.xlu0 %v1200_v8  ;;  %p883_p11 = scmp.ne.s32.totalorder %s1226_s10, %s882_s29  ;;  %s967_s15 = smov [#allocation8]  }
  0x78   : > { %s886_s7 = sshll.u32 %s967_s15, 4  ;;  %s887_s7 = int_to_ptr.vmem [resolvable:$false] %s886_s7 }
  0x79   : > { %695 = vmatmul.mubr.msk.f32.vlgmr.msra.gmra.mrb[0].mxu0 %vm396_vm1, %v384_v10  ;;  %p884_p9 = pnand %p883_p11, %p1291_p7  ;;  %s888_s26 = scalar_lea.vmem %s887_s7, 256 }
  0x7a   : > { %p889_p2 = scmp.lt.s32.totalorder %s1226_s10, %s887_s7  ;;  %p890_p13 = scmp.lt.s32.totalorder %s888_s26, %s882_s29 }
  0x7b   : > { %p885_p12 = pneg %p884_p9 }
  0x7c   : > { %p891_p6 = por %p890_p13, %p889_p2 }
  0x7e   : > { %p892_p10 = pnand %p891_p6, %p885_p12 }
  0xfe   : > { %v355_v23 = vpop.xlane.xlu1 %354 }
  0xff   : > { %v356_v24 = vsub.f32 %v343_v11, %v355_v23 }
 0x101   : > { %v357_v27 = vmul.f32 1.442695, %v356_v24 }
 0x104   : > { %v485_v13 = vpop.xlane.xlu0 %484 }
 0x105   : > { %v486_v14 = vsub.f32 %v1200_v8, %v485_v13 }
 0x107   : > { %v487_v15 = vmul.f32 1.442695, %v486_v14 }
 0x109   : > { %782 = vpow2.f32 %v487_v15 }
 0x113   : > { %v783_v16 = vpop.eup %782 }
 0x114   : > { %489 = vadd.xlane.f32.xlu1 %v783_v16 }
 0x125   : > { %365 = vperm.xlu1 %780, %v345_v17  }
 0x14c   : > { %v466_v19 = vpop.f32.mrb[0].mxu0 }
 0x14d   : > { %v467_v20 = vadd.f32 %v675_v18, %v466_v19  ;;  %v696_v21 = vpop.f32.mrb[1].mxu0 }
 0x14f   : > { %v470_v22 = vmul.f32 0.33333334, %v467_v20 }
 0x151   : > { %471 = vmax.xlane.f32.xlu0 %v470_v22 }
 0x1a1   : > { %v490_v30 = vpop.xlane.xlu1 %489 }
 0x1a5   : > { %v366_v33 = vpop.permute.xlu1 %365 }
 0x1a6   : > { %vm367_vm2 = vcmp.eq.s32.totalorder %v1212_v31, %v366_v33 }
 0x1a7   : > { %v368_v35 = vsel %vm367_vm2, %v343_v11, 0.0 }
 0x1de   : > { %v472_v25 = vpop.xlane.xlu0 %471 }
 0x1df   : > { %v473_v26 = vsub.f32 %v470_v22, %v472_v25 }
 0x1e1   : > { %v474_v28 = vmul.f32 1.442695, %v473_v26 }
 0x1e3   : > { %784 = vpow2.f32 %v474_v28 }
 0x1e4   : > { %786 = vpow2.f32 %v357_v27 }
 0x1e5   : > { %788 = vlog2.f32 %v490_v30 }
 0x1ed   : > { %v785_v32 = vpop.eup %784 }
 0x1ee   : > { %476 = vadd.xlane.f32.xlu0 %v785_v32  ;;  %v787_v34 = vpop.eup %786 }
 0x1ef   : > { %v789_v37 = vpop.eup %788 }
 0x1f0   : > { %v492_v39 = vmul.f32 0.6931472, %v789_v37 }
 0x1f2   : > { %359 = vadd.xlane.f32.xlu0 %v787_v34  ;;  %v493_v40 = vadd.f32 %v492_v39, %v485_v13 }
 0x1f4   : > { %v494_v47 = vsub.f32 %v1200_v8, %v493_v40 }
 0x1f6   : > { %369 = vadd.xlane.f32.xlu0 %v368_v35 }
 0x27b   : > { %v477_v36 = vpop.xlane.xlu0 %476 }
 0x27c   : > { %790 = vlog2.f32 %v477_v36 }
 0x27d   : > { %792 = vrcp.f32 %v477_v36 }
 0x27f   : > { %v360_v38 = vpop.xlane.xlu0 %359 }
 0x280   : > { %794 = vlog2.f32 %v360_v38 }
 0x283   : > { %v370_v53 = vpop.xlane.xlu0 %369 }
 0x286   : > { %v791_v41 = vpop.eup %790 }
 0x287   : > { %v479_v43 = vmul.f32 0.6931472, %v791_v41  ;;  %v793_v45 = vpop.eup %792 }
 0x288   : > { %v482_v51 = vmul.f32 %v793_v45, %v785_v32 }
 0x289   : > { %v480_v46 = vsub.f32 %v473_v26, %v479_v43 }
 0x28a   : > { %v795_v48 = vpop.eup %794 }
 0x28b   : > { %v362_v50 = vmul.f32 0.6931472, %v795_v48  ;;  %v495_v52 = vsub.f32 %v480_v46, %v494_v47 }
 0x28d   : > { %v363_v54 = vadd.f32 %v362_v50, %v355_v23  ;;  %v496_v55 = vmul.f32 %v495_v52, %v482_v51 }
 0x28f   : > { %v371_v56 = vsub.f32 %v363_v54, %v370_v53  ;;  %497 = vadd.xlane.f32.xlu0 %v496_v55 }
 0x291   : > { %v372_v57 = vsel %vm351_vm3, %v371_v56, 0.0 }
 0x292   : > { %v374_v58 = vsel %vm373_vm4, %v372_v57, 0.0 }
 0x293   : > { %375 = vadd.xlane.f32.xlu0 %v374_v58 }
 0x31c   : > { %v498_v59 = vpop.xlane.xlu0 %497 }
 0x31d   : > { %v499_v60 = vsel %vm351_vm3, %v498_v59, 0.0 }
 0x31e   : > { %v500_v61 = vsel %vm373_vm4, %v499_v60, 0.0 }
 0x31f   : > { %501 = vadd.xlane.f32.xlu1 %v500_v61 }
 0x320   : > { %v376_v62 = vpop.xlane.xlu0 %375 }
 0x321   : > { %v377_v63 = vrot.slane %v376_v62, 4 }
 0x323   : > { %v378_v0 = vadd.f32 %v377_v63, %v376_v62 }
 0x325   : > { %v379_v1 = vrot.slane %v378_v0, 2 }
 0x327   : > { %v380_v2 = vadd.f32 %v379_v1, %v378_v0 }
 0x329   : > { %v381_v3 = vrot.slane %v380_v2, 1 }
 0x32b   : > { %v382_v4 = vadd.f32 %v381_v3, %v380_v2 }
 0x32d   : > { %703 = vpush %v382_v4 }
 0x35e   : > { %s704_s19 = spop %703 }
 0x35f   : > { %v517_v13 = vstv %s704_s19 }
 0x3ac   : > { %v502_v5 = vpop.xlane.xlu1 %501 }
 0x3ad   : > { %v503_v6 = vrot.slane %v502_v5, 4 }
 0x3af   : > { %v504_v7 = vadd.f32 %v503_v6, %v502_v5 }
 0x3b1   : > { %v505_v8 = vrot.slane %v504_v7, 2 }
 0x3b3   : > { %v506_v9 = vadd.f32 %v505_v8, %v504_v7 }
 0x3b5   : > { %v507_v10 = vrot.slane %v506_v9, 1 }
 0x3b7   : > { %v508_v11 = vadd.f32 %v507_v10, %v506_v9 }
 0x3b9   : > { %705 = vpush %v508_v11 }
 0x3ea   : > { %s706_s13 = spop %705 }
 0x3eb   : > { %v515_v12 = vstv %s706_s13 }
 0x3ec   : > { %v516_v14 = vsel %vm514_vm8, %v515_v12, 0.0 }
 0x3ed   : > { %v518_v15 = vsel %vm512_vm9, %v517_v13, %v516_v14 }
 0x3ee   : > { %519 = vst [vmem:[%s330_s12] sm:$0xff] %v518_v15 }
 0x3ef   : > { %895 = shalt.err (!%p892_p10)
}
 0x3f0   : > { %s896_s17 = scalar_lea.hbm %s1224_s11, 128  ;;  %s900_s19 = scalar_lea.hbm %s1275_s6, 256 }
 0x3f1   : > { %p897_p0 = scmp.ne.s32.totalorder %s1224_s11, %s896_s17  ;;  %p901_p4 = scmp.lt.u32.totalorder %s1224_s11, %s1275_s6 }
 0x3f2   : > { %p902_p8 = scmp.lt.u32.totalorder %s900_s19, %s896_s17  ;;  %p904_p11 = scmp.lt.u32.totalorder %s896_s17, %s1224_s11 }
 0x3f3   : > { %p898_p1 = pnand %p897_p0, %p1291_p7 }
 0x3f4   : > { %p903_p5 = por %p902_p8, %p901_p4 }
 0x3f5   : > { %p899_p3 = pneg %p898_p1 }
 0x3f6   : > { %p905_p9 = por %p904_p11, %p903_p5 }
 0x3f8   : > { %p906_p12 = pnand %p905_p9, %p899_p3 }
 0x3fa   : > { %909 = shalt.err (!%p906_p12)
}
 0x3fb   : > { %717 = dma.vmem_to_hbm [thread:$0]  (%p1291_p7), %s1226_s10, 128, %s1224_s11, %s521_s25  }
 0x3fc PF: > { %s546_s13 = sand.u32 1, %s944_s21   ;;  %p1292_p2 = scmp.ne.s32.totalorder %s1280_s28, 0 }
 0x3fd   : > { %p1293_p13 = scmp.ge.s32.totalorder %s956_s24, 2  ;;  %s547_s14 = scalar_lea.sflag [#allocation4], %s546_s13 }
 0x3ff   : > { %p731_p6 = pnand %p1293_p13, %p1292_p2 }
 0x401   : > { %939 = dma.done.wait (!%p731_p6), %s547_s14, 128  }
 0x402   : > { %941 = vsyncadd (!%p731_p6), %s547_s14, 4294967168  ;;  %p18_p10 = scmp.ge.s32.totalorder %s1114_s20, 4   ;;  %s1294_s21 = smov %s948_s22 }
 0x403   : > { %s1295_s22 = smov %s952_s23  ;;  %s1296_s23 = smov %s1130_s9 }
 0x404   : > { %s1297_s24 = smov %s1114_s20  ;;  %20 = sbr.rel (!%p18_p10) target bundleno = 5 (0x5), region = 105 }
 0x40b   :  { %552 = vsyncpa [#allocation3], 1 }
 0x40c   :  { %554 = vsyncpa [#allocation3 + $0x1], 1 }
 0x40d   :  { %555 = vsyncpa [#allocation6], 1 }
 0x40e   :  { %556 = vsyncpa [#allocation4], 1 }
 0x40f   :  { %558 = vsyncpa [#allocation4 + $0x1], 1 }

</bundles_post_ra>
